<compile_context>
chip_gen: v5e
topology: v5e:2x2
jax: 0.10.0
libtpu: 0.0.40
codegen_flags: <defaults>
</compile_context>

<pallas_src>
import functools

import jax
import jax.numpy as jnp
from jax.experimental import pallas as pl
from jax.experimental.pallas import tpu as pltpu


# ----------------------------- helpers (wrapper) -----------------------------

def _weight_norm(v, g):
    """PyTorch weight_norm (dim=0): w = g * v / ||v||, norm over non-output dims."""
    norm = jnp.sqrt(jnp.sum(v * v, axis=tuple(range(1, v.ndim)), keepdims=True))
    return g.reshape((-1,) + (1,) * (v.ndim - 1)) * v / norm


def _pick_batch_block(B, L, lane_cap=1024, lane_min=256):
    """Rows stacked per grid step.  Prefer big lane extents, but keep a >=2-way
    grid (v7x megacore) when that still yields >= lane_min lanes per step."""
    divisors = [d for d in range(1, B + 1) if B % d == 0]
    fits = [d for d in divisors if d * L <= lane_cap] or [1]
    bb = max(fits)
    if B // bb == 1:
        par = [d for d in fits if B // d >= 2 and d * L >= lane_min]
        if par:
            bb = max(par)
    return bb


# ------------------------------- Pallas kernel -------------------------------

def _tcn_kernel(x_ref, *refs, level_meta, seq_len):
    """Fused TemporalConvNet forward for one block of lane-stacked batch rows.

    refs = (per-level weight refs ..., out_ref).  Per level (in order):
      w1_cat (C_out, 2*C_in+1), w2_cat (C_out, 2*C_out+1),
      [wd_cat (C_out, C_in+1)]   only if the residual needs a 1x1 conv.
    All weights are bf16 with the bias folded in as the last column.
    """
    out_ref = refs[-1]
    wrefs = refs[:-1]

    h = x_ref[...].astype(jnp.float32)        # (C_in0, N) f32, N = Bb * L
    n = h.shape[1]

    # Constant ones lane-row (bias contraction row), built once.
    ones_row = jnp.ones((1, n), jnp.float32)

    # Memoized time-index iotas / causal masks (JAX does not CSE iota/broadcast,
    # so hoist + reuse instead of re-emitting per conv).
    iota_cache = {}
    mask_cache = {}

    def _causal_mask(d, c):
        key = (d, c)
        if key not in mask_cache:
            if c not in iota_cache:
                t = jax.lax.broadcasted_iota(jnp.int32, (c, n), dimension=1)
                iota_cache[c] = t % seq_len          # time index within each row
            mask_cache[key] = iota_cache[c] >= d
        return mask_cache[key]

    def _causal_shift(v, d):
        """v: (C, N) -> v shifted right by d within each length-L row, zero-filled."""
        rolled = pltpu.roll(v, shift=d, axis=1)       # XLU lane rotation
        return jnp.where(_causal_mask(d, v.shape[0]), rolled, 0.0)

    def _conv(w_cat_ref, v, d):
        """Causal dilated conv (K=2) + bias as a single MXU matmul."""
        x_cat = jnp.concatenate([_causal_shift(v, d), v, ones_row], axis=0)
        return jnp.dot(w_cat_ref[...], x_cat.astype(jnp.bfloat16),
                       preferred_element_type=jnp.float32)

    i = 0
    for dilation, has_downsample in level_meta:
        w1_ref, w2_ref = wrefs[i], wrefs[i + 1]
        i += 2
        x_in = h

        h1 = jnp.maximum(_conv(w1_ref, x_in, dilation), 0.0)
        # TODO(synk): nn.Dropout is identity here (inference-mode forward).
        h2 = jnp.maximum(_conv(w2_ref, h1, dilation), 0.0)

        if has_downsample:
            wd_ref = wrefs[i]
            i += 1
            res_in = jnp.concatenate([x_in, ones_row], axis=0)
            res = jnp.dot(wd_ref[...], res_in.astype(jnp.bfloat16),
                          preferred_element_type=jnp.float32)
        else:
            res = x_in

        h = jnp.maximum(h2 + res, 0.0)

    out_ref[...] = h.astype(out_ref.dtype)


# --------------------------------- wrapper -----------------------------------

def nn_tempconv_forward(x, params):
    """Pallas equivalent of NN_TEMPCONV.forward (== TemporalConvNet.forward).

    x      : (B, obs_dim, L) float32, L a multiple of 128 (lane-dense).
    params : list of per-level dicts with conv1_v/g/b, conv2_v/g/b and, when
             C_in != C_out, down_w/down_b (1x1 residual conv), PyTorch layouts.
    Returns: (B, num_channels[-1], L) float32.
    """
    B, c_in, L = x.shape
    assert L % 128 == 0, "sequence length must be a multiple of 128 (lane-dense)"
    x = x.astype(jnp.float32)

    bb = _pick_batch_block(B, L)
    n_step = bb * L
    grid = (B // bb,)

    # (B, C, L) -> (C, B*L): channels on sublanes, batch-stacked time on lanes.
    x_flat = jnp.transpose(x, (1, 0, 2)).reshape(c_in, B * L)

    flat_inputs = [x_flat]
    in_specs = [pl.BlockSpec((c_in, n_step), lambda g: (0, g))]
    level_meta = []

    def _const_spec(a):
        # Whole-array block, same block every grid step (weights stay resident).
        return pl.BlockSpec(a.shape, lambda g: (0, 0))

    for lvl, p in enumerate(params):
        dilation = 2 ** lvl
        c_out = p["conv1_v"].shape[0]

        # Weight-norm, then fold both taps + bias into one matrix per conv:
        #   w_cat = [W[...,0] | W[...,1] | b]  pairs with  x_cat = [x[t-d]; x[t]; 1]
        w1 = _weight_norm(p["conv1_v"], p["conv1_g"])           # (C_out, C_in, 2)
        w2 = _weight_norm(p["conv2_v"], p["conv2_g"])           # (C_out, C_out, 2)
        w1_cat = jnp.concatenate(
            [w1[:, :, 0], w1[:, :, 1], p["conv1_b"].reshape(c_out, 1)], axis=1)
        w2_cat = jnp.concatenate(
            [w2[:, :, 0], w2[:, :, 1], p["conv2_b"].reshape(c_out, 1)], axis=1)
        level_arrays = [w1_cat.astype(jnp.bfloat16), w2_cat.astype(jnp.bfloat16)]

        has_downsample = c_in != c_out
        if has_downsample:
            wd_cat = jnp.concatenate(
                [p["down_w"][:, :, 0], p["down_b"].reshape(c_out, 1)], axis=1)
            level_arrays.append(wd_cat.astype(jnp.bfloat16))

        for a in level_arrays:
            flat_inputs.append(a)
            in_specs.append(_const_spec(a))

        level_meta.append((dilation, has_downsample))
        c_in = c_out

    kernel = functools.partial(_tcn_kernel,
                               level_meta=tuple(level_meta), seq_len=L)

    out_flat = pl.pallas_call(
        kernel,
        out_shape=jax.ShapeDtypeStruct((c_in, B * L), jnp.float32),
        grid=grid,
        in_specs=in_specs,
        out_specs=pl.BlockSpec((c_in, n_step), lambda g: (0, g)),
        compiler_params=pltpu.CompilerParams(
            dimension_semantics=("parallel",)),
    )(*flat_inputs)

    # (C_out, B*L) -> (B, C_out, L)
    return out_flat.reshape(c_in, B, L).transpose(1, 0, 2)


# --------------------------- pure-JAX reference -------------------------------

def _ref_causal_conv(x, w, b, d):
    B, C_in, L = x.shape
    C_out, _, K = w.shape
    pad = (K - 1) * d
    xp = jnp.pad(x, ((0, 0), (0, 0), (pad, 0)))
    out = jnp.zeros((B, C_out, L), jnp.float32)
    for k in range(K):
        out = out + jnp.einsum(
            "oc,bcl->bol", w[:, :, k], xp[:, :, k * d:k * d + L],
            precision=jax.lax.Precision.HIGHEST)
    return out + b.reshape(1, C_out, 1)


def _ref_forward(x, params):
    h = x
    for lvl, p in enumerate(params):
        d = 2 ** lvl
        w1 = _weight_norm(p["conv1_v"], p["conv1_g"])
        w2 = _weight_norm(p["conv2_v"], p["conv2_g"])
        h1 = jax.nn.relu(_ref_causal_conv(h, w1, p["conv1_b"], d))
        h2 = jax.nn.relu(_ref_causal_conv(h1, w2, p["conv2_b"], d))
        if "down_w" in p:
            res = jnp.einsum("oc,bcl->bol", p["down_w"][:, :, 0], h,
                             precision=jax.lax.Precision.HIGHEST)
            res = res + p["down_b"].reshape(1, -1, 1)
        else:
            res = h
        h = jax.nn.relu(h2 + res)
    return h


# ------------------------------------ demo ------------------------------------

if __name__ == "__main__":
    B, obs_dim, seq_len = 4, 8, 128           # 2 rows lane-stacked/step, 2-way grid
    num_channels = [16, 16]                   # config['num_channels']
    K = 2                                     # TemporalConvNet default kernel_size

    key = jax.random.PRNGKey(0)
    key, xk = jax.random.split(key)
    x = jax.random.normal(xk, (B, obs_dim, seq_len), dtype=jnp.float32)

    params = []
    c_in = obs_dim
    for c_out in num_channels:
        key, *ks = jax.random.split(key, 9)
        p = {
            "conv1_v": 0.01 * jax.random.normal(ks[0], (c_out, c_in, K), jnp.float32),
            "conv1_g": 1.0 + 0.1 * jax.random.normal(ks[1], (c_out,), jnp.float32),
            "conv1_b": 0.1 * jax.random.normal(ks[2], (c_out,), jnp.float32),
            "conv2_v": 0.01 * jax.random.normal(ks[3], (c_out, c_out, K), jnp.float32),
            "conv2_g": 1.0 + 0.1 * jax.random.normal(ks[4], (c_out,), jnp.float32),
            "conv2_b": 0.1 * jax.random.normal(ks[5], (c_out,), jnp.float32),
        }
        if c_in != c_out:
            p["down_w"] = 0.01 * jax.random.normal(ks[6], (c_out, c_in, 1), jnp.float32)
            p["down_b"] = 0.1 * jax.random.normal(ks[7], (c_out,), jnp.float32)
        params.append(p)
        c_in = c_out

    out = nn_tempconv_forward(x, params)
    out = jax.block_until_ready(out)

    ref = _ref_forward(x, params)
    assert out.shape == ref.shape == (B, num_channels[-1], seq_len), (out.shape, ref.shape)
    scale = float(jnp.max(jnp.abs(ref)))
    assert scale > 1e-3, "degenerate reference output"
    max_err = float(jnp.max(jnp.abs(out - ref)))
    # bf16 dot inputs (per the perf review) vs Precision.HIGHEST f32 reference:
    # accuracy cost is ~bf16 rounding per conv, well inside 2e-2 relative.
    assert max_err / scale < 2e-2, f"max abs err {max_err} (scale {scale})"
    print("KERNEL_OK")
</pallas_src>

<mosaic_0001>
module attributes {stable_mosaic.version = 11 : i64} {
  func.func @_tcn_kernel(%arg0: i32, %arg1: memref<8x256xf32, #tpu.memory_space<vmem>>, %arg2: memref<16x17xbf16, #tpu.memory_space<vmem>>, %arg3: memref<16x33xbf16, #tpu.memory_space<vmem>>, %arg4: memref<16x9xbf16, #tpu.memory_space<vmem>>, %arg5: memref<16x33xbf16, #tpu.memory_space<vmem>>, %arg6: memref<16x33xbf16, #tpu.memory_space<vmem>>, %arg7: memref<16x256xf32, #tpu.memory_space<vmem>>) attributes {dimension_semantics = [#tpu.dimension_semantics<parallel>], iteration_bounds = array<i64: 2>, scalar_prefetch = 0 : i64, scratch_operands = 0 : i64, tpu.core_type = #tpu.core_type<tc>, window_params = [{transform_indices = @transform_0, window_bounds = array<i64: 8, 256>}, {pipeline_mode = #tpu.pipeline_mode<synchronous>, transform_indices = @transform_1, window_bounds = array<i64: 16, 17>}, {pipeline_mode = #tpu.pipeline_mode<synchronous>, transform_indices = @transform_2, window_bounds = array<i64: 16, 33>}, {pipeline_mode = #tpu.pipeline_mode<synchronous>, transform_indices = @transform_3, window_bounds = array<i64: 16, 9>}, {pipeline_mode = #tpu.pipeline_mode<synchronous>, transform_indices = @transform_4, window_bounds = array<i64: 16, 33>}, {pipeline_mode = #tpu.pipeline_mode<synchronous>, transform_indices = @transform_5, window_bounds = array<i64: 16, 33>}, {transform_indices = @transform_6, window_bounds = array<i64: 16, 256>}]} {
    %c0 = arith.constant 0 : index
    %c0_0 = arith.constant 0 : index
    %0 = vector.load %arg1[%c0, %c0_0] : memref<8x256xf32, #tpu.memory_space<vmem>>, vector<8x256xf32>
    %cst = arith.constant 1.000000e+00 : f32
    %1 = vector.broadcast %cst : f32 to vector<1x256xf32>
    %c1_i32 = arith.constant 1 : i32
    %2 = tpu.dynamic_rotate %0 by %c1_i32 dim 1 : vector<8x256xf32>, i32 -> vector<8x256xf32>
    %3 = tpu.iota {dimensions = array<i32: 1>} : vector<8x256xi32>
    %c128_i32 = arith.constant 128 : i32
    %c0_i32 = arith.constant 0 : i32
    %4 = arith.cmpi eq, %c128_i32, %c0_i32 : i32
    %c1_i32_1 = arith.constant 1 : i32
    %5 = arith.select %4, %c1_i32_1, %c128_i32 : i32
    %6 = vector.broadcast %5 : i32 to vector<8x256xi32>
    %7 = arith.remsi %3, %6 : vector<8x256xi32>
    %c0_i32_2 = arith.constant 0 : i32
    %8 = vector.broadcast %c0_i32_2 : i32 to vector<8x256xi32>
    %9 = arith.cmpi ne, %7, %8 : vector<8x256xi32>
    %c0_i32_3 = arith.constant 0 : i32
    %10 = vector.broadcast %c0_i32_3 : i32 to vector<8x256xi32>
    %11 = arith.cmpi slt, %7, %10 : vector<8x256xi32>
    %c0_i32_4 = arith.constant 0 : i32
    %12 = arith.cmpi slt, %5, %c0_i32_4 : i32
    %13 = vector.broadcast %12 : i1 to vector<8x256xi1>
    %14 = vector.broadcast %13 : vector<8x256xi1> to vector<8x256xi1>
    %15 = arith.xori %11, %14 : vector<8x256xi1>
    %16 = arith.andi %15, %9 : vector<8x256xi1>
    %17 = vector.broadcast %5 : i32 to vector<8x256xi32>
    %18 = arith.addi %7, %17 : vector<8x256xi32>
    %19 = arith.select %16, %18, %7 : vector<8x256xi1>, vector<8x256xi32>
    %c1_i32_5 = arith.constant 1 : i32
    %20 = vector.broadcast %c1_i32_5 : i32 to vector<8x256xi32>
    %21 = arith.cmpi sge, %19, %20 : vector<8x256xi32>
    %cst_6 = arith.constant 0.000000e+00 : f32
    %22 = vector.broadcast %cst_6 : f32 to vector<8x256xf32>
    %23 = arith.select %21, %2, %22 : vector<8x256xi1>, vector<8x256xf32>
    %24 = tpu.concatenate %23, %0, %1 in 0 : vector<8x256xf32>, vector<8x256xf32>, vector<1x256xf32> -> vector<17x256xf32>
    %c0_7 = arith.constant 0 : index
    %c0_8 = arith.constant 0 : index
    %25 = vector.load %arg2[%c0_7, %c0_8] : memref<16x17xbf16, #tpu.memory_space<vmem>>, vector<16x17xbf16>
    %26 = arith.truncf %24 : vector<17x256xf32> to vector<17x256xbf16>
    %cst_9 = arith.constant dense<0.000000e+00> : vector<16x256xf32>
    %27 = tpu.matmul %25, %26, %cst_9 {dimension_numbers = #tpu.dot_dimension_numbers<[1], [0], [0], [1], [0, 0, 1, 1], [], []>} : vector<16x17xbf16>, vector<17x256xbf16>, vector<16x256xf32> -> vector<16x256xf32>
    %cst_10 = arith.constant 0.000000e+00 : f32
    %28 = vector.broadcast %cst_10 : f32 to vector<16x256xf32>
    %29 = arith.maximumf %27, %28 : vector<16x256xf32>
    %c1_i32_11 = arith.constant 1 : i32
    %30 = tpu.dynamic_rotate %29 by %c1_i32_11 dim 1 : vector<16x256xf32>, i32 -> vector<16x256xf32>
    %31 = tpu.iota {dimensions = array<i32: 1>} : vector<16x256xi32>
    %c128_i32_12 = arith.constant 128 : i32
    %c0_i32_13 = arith.constant 0 : i32
    %32 = arith.cmpi eq, %c128_i32_12, %c0_i32_13 : i32
    %c1_i32_14 = arith.constant 1 : i32
    %33 = arith.select %32, %c1_i32_14, %c128_i32_12 : i32
    %34 = vector.broadcast %33 : i32 to vector<16x256xi32>
    %35 = arith.remsi %31, %34 : vector<16x256xi32>
    %c0_i32_15 = arith.constant 0 : i32
    %36 = vector.broadcast %c0_i32_15 : i32 to vector<16x256xi32>
    %37 = arith.cmpi ne, %35, %36 : vector<16x256xi32>
    %c0_i32_16 = arith.constant 0 : i32
    %38 = vector.broadcast %c0_i32_16 : i32 to vector<16x256xi32>
    %39 = arith.cmpi slt, %35, %38 : vector<16x256xi32>
    %c0_i32_17 = arith.constant 0 : i32
    %40 = arith.cmpi slt, %33, %c0_i32_17 : i32
    %41 = vector.broadcast %40 : i1 to vector<16x256xi1>
    %42 = vector.broadcast %41 : vector<16x256xi1> to vector<16x256xi1>
    %43 = arith.xori %39, %42 : vector<16x256xi1>
    %44 = arith.andi %43, %37 : vector<16x256xi1>
    %45 = vector.broadcast %33 : i32 to vector<16x256xi32>
    %46 = arith.addi %35, %45 : vector<16x256xi32>
    %47 = arith.select %44, %46, %35 : vector<16x256xi1>, vector<16x256xi32>
    %c1_i32_18 = arith.constant 1 : i32
    %48 = vector.broadcast %c1_i32_18 : i32 to vector<16x256xi32>
    %49 = arith.cmpi sge, %47, %48 : vector<16x256xi32>
    %cst_19 = arith.constant 0.000000e+00 : f32
    %50 = vector.broadcast %cst_19 : f32 to vector<16x256xf32>
    %51 = arith.select %49, %30, %50 : vector<16x256xi1>, vector<16x256xf32>
    %52 = tpu.concatenate %51, %29, %1 in 0 : vector<16x256xf32>, vector<16x256xf32>, vector<1x256xf32> -> vector<33x256xf32>
    %c0_20 = arith.constant 0 : index
    %c0_21 = arith.constant 0 : index
    %53 = vector.load %arg3[%c0_20, %c0_21] : memref<16x33xbf16, #tpu.memory_space<vmem>>, vector<16x33xbf16>
    %54 = arith.truncf %52 : vector<33x256xf32> to vector<33x256xbf16>
    %cst_22 = arith.constant dense<0.000000e+00> : vector<16x256xf32>
    %55 = tpu.matmul %53, %54, %cst_22 {dimension_numbers = #tpu.dot_dimension_numbers<[1], [0], [0], [1], [0, 0, 1, 1], [], []>} : vector<16x33xbf16>, vector<33x256xbf16>, vector<16x256xf32> -> vector<16x256xf32>
    %cst_23 = arith.constant 0.000000e+00 : f32
    %56 = vector.broadcast %cst_23 : f32 to vector<16x256xf32>
    %57 = arith.maximumf %55, %56 : vector<16x256xf32>
    %58 = tpu.concatenate %0, %1 in 0 : vector<8x256xf32>, vector<1x256xf32> -> vector<9x256xf32>
    %c0_24 = arith.constant 0 : index
    %c0_25 = arith.constant 0 : index
    %59 = vector.load %arg4[%c0_24, %c0_25] : memref<16x9xbf16, #tpu.memory_space<vmem>>, vector<16x9xbf16>
    %60 = arith.truncf %58 : vector<9x256xf32> to vector<9x256xbf16>
    %cst_26 = arith.constant dense<0.000000e+00> : vector<16x256xf32>
    %61 = tpu.matmul %59, %60, %cst_26 {dimension_numbers = #tpu.dot_dimension_numbers<[1], [0], [0], [1], [0, 0, 1, 1], [], []>} : vector<16x9xbf16>, vector<9x256xbf16>, vector<16x256xf32> -> vector<16x256xf32>
    %62 = arith.addf %57, %61 : vector<16x256xf32>
    %cst_27 = arith.constant 0.000000e+00 : f32
    %63 = vector.broadcast %cst_27 : f32 to vector<16x256xf32>
    %64 = arith.maximumf %62, %63 : vector<16x256xf32>
    %c2_i32 = arith.constant 2 : i32
    %65 = tpu.dynamic_rotate %64 by %c2_i32 dim 1 : vector<16x256xf32>, i32 -> vector<16x256xf32>
    %c2_i32_28 = arith.constant 2 : i32
    %66 = vector.broadcast %c2_i32_28 : i32 to vector<16x256xi32>
    %67 = arith.cmpi sge, %47, %66 : vector<16x256xi32>
    %cst_29 = arith.constant 0.000000e+00 : f32
    %68 = vector.broadcast %cst_29 : f32 to vector<16x256xf32>
    %69 = arith.select %67, %65, %68 : vector<16x256xi1>, vector<16x256xf32>
    %70 = tpu.concatenate %69, %64, %1 in 0 : vector<16x256xf32>, vector<16x256xf32>, vector<1x256xf32> -> vector<33x256xf32>
    %c0_30 = arith.constant 0 : index
    %c0_31 = arith.constant 0 : index
    %71 = vector.load %arg5[%c0_30, %c0_31] : memref<16x33xbf16, #tpu.memory_space<vmem>>, vector<16x33xbf16>
    %72 = arith.truncf %70 : vector<33x256xf32> to vector<33x256xbf16>
    %cst_32 = arith.constant dense<0.000000e+00> : vector<16x256xf32>
    %73 = tpu.matmul %71, %72, %cst_32 {dimension_numbers = #tpu.dot_dimension_numbers<[1], [0], [0], [1], [0, 0, 1, 1], [], []>} : vector<16x33xbf16>, vector<33x256xbf16>, vector<16x256xf32> -> vector<16x256xf32>
    %cst_33 = arith.constant 0.000000e+00 : f32
    %74 = vector.broadcast %cst_33 : f32 to vector<16x256xf32>
    %75 = arith.maximumf %73, %74 : vector<16x256xf32>
    %c2_i32_34 = arith.constant 2 : i32
    %76 = tpu.dynamic_rotate %75 by %c2_i32_34 dim 1 : vector<16x256xf32>, i32 -> vector<16x256xf32>
    %cst_35 = arith.constant 0.000000e+00 : f32
    %77 = vector.broadcast %cst_35 : f32 to vector<16x256xf32>
    %78 = arith.select %67, %76, %77 : vector<16x256xi1>, vector<16x256xf32>
    %79 = tpu.concatenate %78, %75, %1 in 0 : vector<16x256xf32>, vector<16x256xf32>, vector<1x256xf32> -> vector<33x256xf32>
    %c0_36 = arith.constant 0 : index
    %c0_37 = arith.constant 0 : index
    %80 = vector.load %arg6[%c0_36, %c0_37] : memref<16x33xbf16, #tpu.memory_space<vmem>>, vector<16x33xbf16>
    %81 = arith.truncf %79 : vector<33x256xf32> to vector<33x256xbf16>
    %cst_38 = arith.constant dense<0.000000e+00> : vector<16x256xf32>
    %82 = tpu.matmul %80, %81, %cst_38 {dimension_numbers = #tpu.dot_dimension_numbers<[1], [0], [0], [1], [0, 0, 1, 1], [], []>} : vector<16x33xbf16>, vector<33x256xbf16>, vector<16x256xf32> -> vector<16x256xf32>
    %cst_39 = arith.constant 0.000000e+00 : f32
    %83 = vector.broadcast %cst_39 : f32 to vector<16x256xf32>
    %84 = arith.maximumf %82, %83 : vector<16x256xf32>
    %85 = arith.addf %84, %64 : vector<16x256xf32>
    %cst_40 = arith.constant 0.000000e+00 : f32
    %86 = vector.broadcast %cst_40 : f32 to vector<16x256xf32>
    %87 = arith.maximumf %85, %86 : vector<16x256xf32>
    %c0_41 = arith.constant 0 : index
    %c0_42 = arith.constant 0 : index
    %88 = vector.load %arg7[%c0_41, %c0_42] : memref<16x256xf32, #tpu.memory_space<vmem>>, vector<16x256xf32>
    tpu.vector_store %arg7[%c0_41, %c0_42], %87 {strides = array<i32>} : memref<16x256xf32, #tpu.memory_space<vmem>>, vector<16x256xf32>,
    return
  }
  func.func @transform_0(%arg0: i32) -> (i32, i32) {
    %c0_i32 = arith.constant 0 : i32
    %c0_i32_0 = arith.constant 0 : i32
    return %c0_i32, %arg0 : i32, i32
  }
  func.func @transform_1(%arg0: i32) -> (i32, i32) {
    %c0_i32 = arith.constant 0 : i32
    %c0_i32_0 = arith.constant 0 : i32
    %c0_i32_1 = arith.constant 0 : i32
    return %c0_i32, %c0_i32_0 : i32, i32
  }
  func.func @transform_2(%arg0: i32) -> (i32, i32) {
    %c0_i32 = arith.constant 0 : i32
    %c0_i32_0 = arith.constant 0 : i32
    %c0_i32_1 = arith.constant 0 : i32
    return %c0_i32, %c0_i32_0 : i32, i32
  }
  func.func @transform_3(%arg0: i32) -> (i32, i32) {
    %c0_i32 = arith.constant 0 : i32
    %c0_i32_0 = arith.constant 0 : i32
    %c0_i32_1 = arith.constant 0 : i32
    return %c0_i32, %c0_i32_0 : i32, i32
  }
  func.func @transform_4(%arg0: i32) -> (i32, i32) {
    %c0_i32 = arith.constant 0 : i32
    %c0_i32_0 = arith.constant 0 : i32
    %c0_i32_1 = arith.constant 0 : i32
    return %c0_i32, %c0_i32_0 : i32, i32
  }
  func.func @transform_5(%arg0: i32) -> (i32, i32) {
    %c0_i32 = arith.constant 0 : i32
    %c0_i32_0 = arith.constant 0 : i32
    %c0_i32_1 = arith.constant 0 : i32
    return %c0_i32, %c0_i32_0 : i32, i32
  }
  func.func @transform_6(%arg0: i32) -> (i32, i32) {
    %c0_i32 = arith.constant 0 : i32
    %c0_i32_0 = arith.constant 0 : i32
    return %c0_i32, %arg0 : i32, i32
  }
}

</mosaic_0001>

<bundles_post_ra>
// kernel: tpu_custom_call.1
= control target key start
LH: loop header
LB: loop body
LE: loop exit
PB: predicated region body
PF: predicated region fallthrough
CT: control target
= control target key end

     0   :  { %11 = vsyncpa [#allocation3], 0  ;;  %s1683_s0 = inlined_call_operand.hbm [shape: f32[8,512], index: 0, kind: input, shape index: {}]   ;;  %s1684_s1 = inlined_call_operand.hbm [shape: bf16[16,17], index: 1, kind: input, shape index: {}]   ;;  %s1685_s2 = inlined_call_operand.hbm [shape: bf16[16,33], index: 2, kind: input, shape index: {}]   ;;  %s1686_s3 = inlined_call_operand.hbm [shape: bf16[16,9], index: 3, kind: input, shape index: {}]   ;;  %s1687_s4 = inlined_call_operand.hbm [shape: bf16[16,33], index: 4, kind: input, shape index: {}]   ;;  %s1688_s5 = inlined_call_operand.hbm [shape: bf16[16,33], index: 5, kind: input, shape index: {}]   ;;  %s1689_s6 = inlined_call_operand.hbm [shape: f32[16,512], index: 6, kind: output, shape index: {}]  }
   0x1   :  { %13 = vsyncpa [#allocation3 + $0x1], 0 }
   0x2   :  { %14 = vsyncpa [#allocation6], 0 }
   0x3   :  { %15 = vsyncpa [#allocation9], 0 }
   0x4   :  { %16 = vsyncpa [#allocation12], 0 }
   0x5   :  { %17 = vsyncpa [#allocation4], 0 }
   0x6   :  { %19 = vsyncpa [#allocation4 + $0x1], 0  ;;  %s1383_s21 = smov 0   ;;  %s1385_s22 = smov 0  }
   0x7   :  { %s1387_s23 = smov 0   ;;  %s1389_s24 = smov 0  }
   0x8 LB: > { %s198_s27 = sshll.u32 %s1684_s1, 4  ;;  %s1407_s28 = sadd.s32 4294967295, %s1331_s24   ;;  %s1331_s24 = sphi %s1389_s24, %s1706_s24   ;;  %s1327_s23 = sphi %s1387_s23, %s1705_s23   ;;  %s1323_s22 = sphi %s1385_s22, %s1704_s22   ;;  %s1319_s21 = sphi %s1383_s21, %s1703_s21   ;;  %s199_s27 = int_to_ptr.hbm [resolvable:$true] %s198_s27 }
   0x9   : > { %p847_p0 = scmp.ge.s32.totalorder %s1331_s24, 1  ;;  %p46_p1 = scmp.eq.s32.totalorder %s1407_s28, 0 }
   0xa   : > { %p187_p2 = scmp.lt.s32.totalorder %s1331_s24, 3  ;;  %s1333_s30 = smov [#allocation5]  }
   0xb   : > { %s200_s7 = sshll.u32 %s1333_s30, 4  ;;  %s226_s10 = sshll.u32 %s1686_s3, 4  ;;  %s201_s7 = int_to_ptr.vmem [resolvable:$true] %s200_s7  ;;  %s227_s10 = int_to_ptr.hbm [resolvable:$true] %s226_s10 }
   0xc   : > { %p1412_p3 = pnand %p847_p0, %p187_p2  ;;  %s212_s14 = sshll.u32 %s1685_s2, 4  ;;  %s213_s14 = int_to_ptr.hbm [resolvable:$true] %s212_s14 }
   0xd   : > { %s1334_s15 = smov [#allocation8]   ;;  %s1335_s17 = smov 64  }
   0xe   : > { %p955_p4 = pneg %p1412_p3  ;;  %s228_s16 = sshll.u32 %s1334_s15, 4  ;;  %s229_s16 = int_to_ptr.vmem [resolvable:$true] %s228_s16 }
   0xf   : > { %s1336_s18 = smov 4   ;;  %s240_s25 = sshll.u32 %s1687_s4, 4  ;;  %s241_s25 = int_to_ptr.hbm [resolvable:$true] %s240_s25 }
  0x10   : > { %p1424_p6 = pnand %p955_p4, %p46_p1  ;;  %s1337_s26 = smov [#allocation7]  }
  0x11   : > { %s214_s30 = sshll.u32 %s1337_s26, 4  ;;  %s1339_s12 = smov [#allocation11]   ;;  %s215_s30 = int_to_ptr.vmem [resolvable:$true] %s214_s30 }
  0x12   : > { %958 = dma.hbm_to_vmem [thread:$0]  (!%p1424_p6), %s199_s27, 128, %s201_s7, [#allocation6], %s1335_s17, %s1335_s17, %s1336_s18  }
  0x13   : > { %964 = dma.hbm_to_vmem [thread:$0]  (!%p1424_p6), %s227_s10, 128, %s229_s16, [#allocation9], %s1335_s17, %s1335_s17, %s1336_s18  }
  0x14   : > { %961 = dma.hbm_to_vmem [thread:$0]  (!%p1424_p6), %s213_s14, 128, %s215_s30, [#allocation6], %s1335_s17, %s1335_s17, %s1336_s18  }
  0x15   : > { %s1338_s27 = smov [#allocation10]   ;;  %s254_s10 = sshll.u32 %s1688_s5, 4  ;;  %s255_s10 = int_to_ptr.hbm [resolvable:$true] %s254_s10 }
  0x16   : > { %s242_s7 = sshll.u32 %s1338_s27, 4  ;;  %s256_s13 = sshll.u32 %s1339_s12, 4  ;;  %s243_s7 = int_to_ptr.vmem [resolvable:$true] %s242_s7  ;;  %s257_s13 = int_to_ptr.vmem [resolvable:$true] %s256_s13 }
  0x17   : > { %967 = dma.hbm_to_vmem [thread:$0]  (!%p1424_p6), %s241_s25, 128, %s243_s7, [#allocation9], %s1335_s17, %s1335_s17, %s1336_s18  }
  0x18   : > { %970 = dma.hbm_to_vmem [thread:$0]  (!%p1424_p6), %s255_s10, 128, %s257_s13, [#allocation12], %s1335_s17, %s1335_s17, %s1336_s18  }
  0x19   : > { %s846_s14 = sadd.s32 4294967294, %s1331_s24   ;;  %s1449_s15 = sadd.s32 1, %s1331_s24  }
  0x1a   : > { %s32_s16 = sadd.s32 1, %s1327_s23  ;;  %s29_s19 = ssub.s32 %s1331_s24, %s1449_s15 }
  0x1b   : > { %p39_p7 = scmp.ne.s32.totalorder %s1327_s23, %s1323_s22  ;;  %p30_p8 = scmp.eq.s32.totalorder %s29_s19, 0 }
  0x1c   : > { %p40_p9 = scmp.eq.s32.totalorder %s1331_s24, 0  ;;  %p45_p10 = scmp.ne.s32.totalorder %s1323_s22, %s1319_s21 }
  0x1d   : > { %p174_p11 = scmp.eq.s32.totalorder %s1407_s28, 1  ;;  %p180_p0 = scmp.eq.s32.totalorder %s846_s14, 1 }
  0x1e   : > { %s1461_s20 = scalar_select %p30_p8, %s1327_s23, %s32_s16  }
  0x1f   : > { %p1465_p12 = por %p46_p1, %p45_p10  ;;  %p1469_p13 = por %p174_p11, %p39_p7 }
  0x20   : > { %p41_p2 = por %p40_p9, %p39_p7  ;;  %s270_s18 = sand.u32 1, %s1327_s23  }
  0x21   : > { %p1474_p4 = por %p180_p0, %p45_p10  ;;  %p984_p6 = scmp.lt.s32.totalorder %s1331_s24, 2 }
  0x22   : > { %s854_s26 = sshll.u32 %s270_s18, 4  ;;  %s924_s30 = sshll.u32 %s1331_s24, 4 }
  0x23   : > { %s279_s8 = scalar_lea.hbm %s1683_s0, %s924_s30  ;;  %s274_s10 = scalar_lea.vmem [#allocation2], %s854_s26 }
  0x24   : > { %s281_s9 = sshll.u32 %s279_s8, 4  ;;  %s283_s12 = sshll.u32 %s274_s10, 4  ;;  %s282_s9 = int_to_ptr.hbm [resolvable:$true] %s281_s9  ;;  %s284_s12 = int_to_ptr.vmem [resolvable:$true] %s283_s12 }
  0x25   : > { %p1483_p8 = pnand %p984_p6, %p41_p2  ;;  %s271_s14 = scalar_lea.sflag [#allocation3], %s270_s18 }
  0x26   : > { %s1223_s16 = sshra.s32 %s282_s9, 4  ;;  %s1230_s26 = scalar_lea.hbm %s1683_s0, 32  ;;  %s1224_s16 = int_to_ptr.hbm [resolvable:$true] %s1223_s16 }
  0x27   : > { %s1225_s19 = scalar_lea.hbm %s1224_s16, 16  ;;  %p1227_p9 = pneg %p1483_p8 }
  0x28   : > { %p1226_p7 = scmp.ne.s32.totalorder %s1224_s16, %s1225_s19  ;;  %p1231_p0 = scmp.lt.s32.totalorder %s1224_s16, %s1683_s0 }
  0x29   : > { %p1232_p2 = scmp.lt.s32.totalorder %s1230_s26, %s1225_s19 }
  0x2a   : > { %p1228_p10 = pnand %p1227_p9, %p1226_p7 }
  0x2b   : > { %p1233_p6 = por %p1232_p2, %p1231_p0 }
  0x2c   : > { %p1229_p11 = pneg %p1228_p10 }
  0x2e   : > { %p1234_p5 = pnand %p1233_p6, %p1229_p11 }
  0x30   : > { %1237 = shalt.err (!%p1234_p5)
}
  0x31   : > { %974 = dma.hbm_to_vmem [thread:$0]  (!%p1483_p8), %s282_s9, 256, %s284_s12, %s271_s14  }
  0x32   : > { %292 = sbr.rel (%p1412_p3) target bundleno = 1134 (0x46e), region = 44  ;;  %s1500_s18 = sand.u32 (!%p1412_p3), 1, %s1323_s22  }
  0x33   : > { %s858_s10 = sshll.u32 (!%p1412_p3), %s1500_s18, 4  ;;  %s295_s30 = scalar_lea.sflag (!%p1412_p3), [#allocation3], %s1500_s18 }
  0x34   : > { %s298_s27 = scalar_lea.vmem (!%p1412_p3), [#allocation2], %s858_s10 }
  0x37   : > { %1298 = dma.done.wait (%p1465_p12), %s295_s30, 256  }
  0x38   : > { %1300 = vsyncadd (%p1465_p12), %s295_s30, 4294967040 }
  0x39   : > { %1302 = dma.done.wait (%p46_p1), [#allocation6], 256  }
  0x3a   : > { %1304 = vsyncadd (%p46_p1), [#allocation6], 4294967040 }
  0x3b   : > { %1306 = dma.done.wait (%p46_p1), [#allocation9], 256  }
  0x3c   : > { %1308 = vsyncadd (%p46_p1), [#allocation9], 4294967040 }
  0x3d   : > { %1310 = dma.done.wait (%p46_p1), [#allocation12], 128  }
  0x3e   : > { %1312 = vsyncadd (%p46_p1), [#allocation12], 4294967168  ;;  %v356_v0 = vld [vmem:[%s298_s27] sm:$0xff]  ;;  %v1520_v1 = vld [vmem:[%s298_s27 + $0x8] sm:$0xff]  ;;  %s1340_s29 = smov 1   ;;  %vm410_vm0 = vcmask 1040384   ;;  %v362_v6 = vlaneseq }
  0x3f   : > { %v1038_v2 = vpack.i.bf16 %v1520_v1, %v356_v0  ;;  %v1341_v3 = vmov 0   ;;  %vm1342_vm4 = vmmov 1   ;;  %v925_v18 = vld [vmem:[#allocation5] sm:$0xff]  ;;  %vm406_vm7 = vcmask 138240   ;;  %v927_v36 = vld [vmem:[#allocation8] sm:$0xff]  ;;  %v926_v51 = vld [vmem:[#allocation7] sm:$0xff] }
  0x40   : > { %v412_v4 = vsel %vm410_vm0, 65535, %v1341_v3  ;;  %v1530_v7 = vand.u32 127, %v362_v6  ;;  %v513_v31 = vpack.c.bf16 1.0, %v356_v0  ;;  %vm524_vm8 = vcmask 1043456   ;;  %s1344_s11 = smov 2   ;;  %s864_s9 = sshll.u32 %s1500_s18, 5 }
  0x41   : > { %1039 = vrot.lane.b32.xlu0 %v1038_v2, %s1340_s29  ;;  %v1524_v5 = vand.u32 1.0|1.0, %v412_v4  ;;  %vm525_vm9 = vcmask 1044480   ;;  %v1343_v32 = vmov 65535   ;;  %vm520_vm10 = vcmask 72704   ;;  %s930_s12 = sshll.u32 %s1407_s28, 4 }
  0x42   : > { %v1533_v8 = vadd.s32 128, %v1530_v7  ;;  %vm392_vm1 = vcmp.ge.s32.totalorder %v1530_v7, 1  ;;  %vm364_vm2 = vcmp.lt.s32.totalorder %v1530_v7, 1  ;;  %v526_v33 = vsel %vm524_vm8, 4294967295, %v1343_v32  ;;  %s352_s13 = scalar_lea.vmem [#allocation13], %s864_s9  ;;  %s721_s19 = scalar_lea.hbm %s1689_s6, %s930_s12 }
  0x43   : > { %422 = vmatpush.bf16.msra.mxu0 %v1524_v5  ;;  %436 = vmatpush.bf16.msra.mxu1 %v1524_v5  ;;  %vm869_vm5 = vmpackc.low %vm1342_vm4, %vm392_vm1  ;;  %v527_v34 = vsel %vm525_vm9, %v526_v33, 0  ;;  %v514_v37 = vpack.c.bf16 1.0, %v1520_v1  ;;  %vm475_vm13 = vcmask 269312   ;;  %vm583_vm14 = vcmp.ge.s32.totalorder %v1530_v7, 2  ;;  %s722_s26 = sshll.u32 %s352_s13, 4  ;;  %s724_s7 = sshll.u32 %s721_s19, 4  ;;  %s723_s26 = int_to_ptr.vmem [resolvable:$true] %s722_s26  ;;  %s725_s7 = int_to_ptr.hbm [resolvable:$true] %s724_s7 }
  0x44   : > { %484 = vmatpush.bf16.msra.mxu2 %v1524_v5  ;;  %498 = vmatpush.bf16.msra.mxu3 %v1524_v5  ;;  %v379_v9 = vand.u32 127, %v1533_v8  ;;  %v529_v35 = vand.u32 %v527_v34, %v513_v31  ;;  %vm881_vm11 = vmpackc.low %vm392_vm1, %vm392_vm1  ;;  %vm578_vm15 = vcmp.lt.s32.totalorder %v1530_v7, 2  ;;  %s710_s28 = scalar_lea.sflag [#allocation4], %s1500_s18  ;;  %s1267_s8 = sshra.s32 %s725_s7, 4  ;;  %s1268_s8 = int_to_ptr.hbm [resolvable:$true] %s1267_s8 }
  0x45   : > { %v532_v38 = vand.u32 %v527_v34, %v514_v37  ;;  %vm1602_vm1 = vmpackc.low %vm583_vm14, %vm583_vm14  ;;  %s1269_s10 = scalar_lea.hbm %s1268_s8, 32  ;;  %p1274_p12 = scmp.lt.s32.totalorder %s1268_s8, %s1689_s6 }
  0x46   : > { %vm1540_vm3 = vcmp.ge.s32.totalorder %v379_v9, 1  ;;  %vm1598_vm0 = vcmp.ge.s32.totalorder %v379_v9, 2  ;;  %p1270_p1 = scmp.ne.s32.totalorder %s1268_s8, %s1269_s10 }
  0x47   : > { %vm873_vm6 = vmpackc.low %vm1342_vm4, %vm1540_vm3 }
  0x48   : > { %vm885_vm12 = vmpackc.low %vm1540_vm3, %vm1540_vm3  ;;  %p1271_p3 = pnand %p1270_p1, %p1469_p13 }
  0x4a   : > { %p1272_p5 = pneg %p1271_p3 }
  0xb3   : > { %v1040_v10 = vpop.permute.xlu0 %1039 }
  0xb4   : > { %v1042_v12 = vunpack.i.h.bf16 %v1040_v10  ;;  %v1041_v13 = vunpack.i.l.bf16 %v1040_v10 }
  0xb6   : > { %v366_v14 = vsel %vm364_vm2, %v1042_v12, %v1041_v13  ;;  %v365_v15 = vsel %vm364_vm2, %v1041_v13, %v1042_v12 }
  0xb7   : > { %v870_v16 = vpack.c.bf16 %v356_v0, %v366_v14  ;;  %v874_v17 = vpack.c.bf16 %v1520_v1, %v365_v15 }
  0xb9   : > { %871 = vmatpush.bf16.msk.msra.mxu0 %vm869_vm5, %v870_v16  ;;  %875 = vmatpush.bf16.msk.msra.mxu1 %vm873_vm6, %v874_v17 }
  0xbc   : > { %872 = vmatmul.msk.bf16.vlgmr.msra.gmra.mxu0 %vm406_vm7, %v925_v18  ;;  %876 = vmatmul.msk.bf16.vlgmr.msra.gmra.mxu1 %vm406_vm7, %v925_v18 }
  0xbd   : > { %541 = vmatpush.bf16.msrb.mxu0 %v529_v35  ;;  %555 = vmatpush.bf16.msrb.mxu1 %v532_v38 }
  0xc1   : > { %670 = vmatpush.bf16.msra.mxu0 %v1524_v5  ;;  %684 = vmatpush.bf16.msra.mxu1 %v1524_v5 }
  0xcc   : > { %893 = vmatmul.msk.bf16.vlgmr.msrb.gmra.mxu0 %vm520_vm10, %v927_v36  ;;  %894 = vmatmul.msk.bf16.vlgmr.msrb.gmra.mxu1 %vm520_vm10, %v927_v36 }
 0x139   : > { %v425_v19 = vpop.f32.mrf.mxu0  ;;  %v439_v20 = vpop.f32.mrf.mxu1 }
 0x13a   : > { %v444_v23 = vmax.f32 %v425_v19, 0.0  ;;  %v445_v24 = vmax.f32 %v439_v20, 0.0 }
 0x141   : > { %v427_v21 = vpop.f32.mrf.mxu0  ;;  %v441_v22 = vpop.f32.mrf.mxu1 }
 0x142   : > { %v446_v25 = vmax.f32 %v427_v21, 0.0  ;;  %v447_v26 = vmax.f32 %v441_v22, 0.0 }
 0x144   : > { %v1043_v27 = vpack.i.bf16 %v446_v25, %v444_v23  ;;  %v468_v28 = vpack.c.bf16 %v446_v25, %v444_v23  ;;  %v1048_v29 = vpack.i.bf16 %v447_v26, %v445_v24  ;;  %v469_v30 = vpack.c.bf16 %v447_v26, %v445_v24 }
 0x146   : > { %1044 = vrot.lane.b32.xlu0 %v1043_v27, %s1340_s29  ;;  %485 = vmatpush.bf16.msra.mxu2 %v468_v28  ;;  %v928_v27 = vld [vmem:[#allocation10] sm:$0xff] }
 0x147   : > { %1049 = vrot.lane.b32.xlu1 %v1048_v29, %s1340_s29  ;;  %499 = vmatpush.bf16.msra.mxu3 %v469_v30  ;;  %s1273_s29 = scalar_lea.hbm %s1689_s6, 64 }
 0x148   : > { %p1275_p8 = scmp.lt.s32.totalorder %s1273_s29, %s1269_s10 }
 0x149   : > { %v557_v52 = vpop.f32.mrf.mxu1  ;;  %v543_v53 = vpop.f32.mrf.mxu0 }
 0x14a   : > { %p1276_p7 = por %p1275_p8, %p1274_p12 }
 0x14c   : > { %p1277_p9 = pnand %p1276_p7, %p1272_p5 }
 0x151   : > { %v559_v59 = vpop.f32.mrf.mxu1  ;;  %v545_v1 = vpop.f32.mrf.mxu0 }
 0x1b8   : > { %v1045_v39 = vpop.permute.xlu0 %1044 }
 0x1b9   : > { %v1047_v40 = vunpack.i.h.bf16 %v1045_v39  ;;  %v1046_v41 = vunpack.i.l.bf16 %v1045_v39  ;;  %v1050_v42 = vpop.permute.xlu1 %1049 }
 0x1ba   : > { %v1052_v43 = vunpack.i.h.bf16 %v1050_v42  ;;  %v1051_v44 = vunpack.i.l.bf16 %v1050_v42 }
 0x1bc   : > { %v458_v45 = vsel %vm364_vm2, %v1051_v44, %v1046_v41  ;;  %v459_v46 = vsel %vm364_vm2, %v1052_v43, %v1047_v40  ;;  %v456_v47 = vsel %vm364_vm2, %v1046_v41, %v1051_v44  ;;  %v457_v48 = vsel %vm364_vm2, %v1047_v40, %v1052_v43  ;;  %vm903_vm2 = vmpackc.low %vm1598_vm0, %vm1598_vm0 }
 0x1bd   : > { %v882_v49 = vpack.c.bf16 %v459_v46, %v458_v45  ;;  %v886_v50 = vpack.c.bf16 %v457_v48, %v456_v47 }
 0x1bf   : > { %883 = vmatpush.bf16.msk.msra.mxu2 %vm881_vm11, %v882_v49  ;;  %887 = vmatpush.bf16.msk.msra.mxu3 %vm885_vm12, %v886_v50 }
 0x1c2   : > { %884 = vmatmul.msk.bf16.vlgmr.msra.gmra.mxu2 %vm475_vm13, %v926_v51  ;;  %888 = vmatmul.msk.bf16.vlgmr.msra.gmra.mxu3 %vm475_vm13, %v926_v51 }
 0x1c3   : > { %608 = vmatpush.bf16.msrb.mxu2 %v1524_v5  ;;  %622 = vmatpush.bf16.msrb.mxu3 %v1524_v5 }
 0x245   : > { %v488_v54 = vpop.f32.mrf.mxu2  ;;  %v502_v55 = vpop.f32.mrf.mxu3 }
 0x246   : > { %v508_v56 = vmax.f32 %v502_v55, 0.0  ;;  %v507_v57 = vmax.f32 %v488_v54, 0.0 }
 0x248   : > { %v563_v58 = vadd.f32 %v557_v52, %v508_v56  ;;  %v562_v62 = vadd.f32 %v543_v53, %v507_v57  ;;  %v929_v52 = vld [vmem:[#allocation11] sm:$0xff] }
 0x24a   : > { %v1576_v3 = vmax.f32 %v563_v58, 0.0  ;;  %v1578_v5 = vmax.f32 %v562_v62, 0.0 }
 0x24d   : > { %v490_v60 = vpop.f32.mrf.mxu2  ;;  %v504_v61 = vpop.f32.mrf.mxu3 }
 0x24e   : > { %v509_v63 = vmax.f32 %v490_v60, 0.0  ;;  %v510_v0 = vmax.f32 %v504_v61, 0.0 }
 0x250   : > { %v564_v2 = vadd.f32 %v545_v1, %v509_v63  ;;  %v565_v4 = vadd.f32 %v559_v59, %v510_v0 }
 0x252   : > { %v1580_v6 = vmax.f32 %v564_v2, 0.0  ;;  %v1582_v10 = vmax.f32 %v565_v4, 0.0 }
 0x254   : > { %v1053_v11 = vpack.i.bf16 %v1580_v6, %v1578_v5  ;;  %v593_v12 = vpack.c.bf16 %v1580_v6, %v1578_v5  ;;  %v1058_v13 = vpack.i.bf16 %v1582_v10, %v1576_v3  ;;  %v594_v14 = vpack.c.bf16 %v1582_v10, %v1576_v3 }
 0x256   : > { %1054 = vrot.lane.b32.xlu1 %v1053_v11, %s1344_s11  ;;  %609 = vmatpush.bf16.msrb.mxu2 %v593_v12 }
 0x257   : > { %1059 = vrot.lane.b32.xlu2 %v1058_v13, %s1344_s11  ;;  %623 = vmatpush.bf16.msrb.mxu3 %v594_v14 }
 0x2b1   : > { %v1060_v15 = vpop.permute.xlu2 %1059 }
 0x2b2   : > { %v1062_v18 = vunpack.i.h.bf16 %v1060_v15  ;;  %v1061_v19 = vunpack.i.l.bf16 %v1060_v15 }
 0x2c8   : > { %v1055_v16 = vpop.permute.xlu1 %1054 }
 0x2c9   : > { %v1057_v20 = vunpack.i.h.bf16 %v1055_v16  ;;  %v1056_v21 = vunpack.i.l.bf16 %v1055_v16 }
 0x2cb   : > { %v581_v23 = vsel %vm578_vm15, %v1061_v19, %v1056_v21  ;;  %v582_v24 = vsel %vm578_vm15, %v1062_v18, %v1057_v20  ;;  %v579_v8 = vsel %vm578_vm15, %v1056_v21, %v1061_v19  ;;  %v580_v9 = vsel %vm578_vm15, %v1057_v20, %v1062_v18 }
 0x2cc   : > { %v900_v25 = vpack.c.bf16 %v582_v24, %v581_v23  ;;  %v904_v26 = vpack.c.bf16 %v580_v9, %v579_v8 }
 0x2ce   : > { %901 = vmatpush.bf16.msk.msrb.mxu2 %vm1602_vm1, %v900_v25  ;;  %905 = vmatpush.bf16.msk.msrb.mxu3 %vm903_vm2, %v904_v26 }
 0x2d1   : > { %906 = vmatmul.msk.bf16.vlgmr.msrb.gmra.mxu3 %vm475_vm13, %v928_v27  ;;  %902 = vmatmul.msk.bf16.vlgmr.msrb.gmra.mxu2 %vm475_vm13, %v928_v27 }
 0x354   : > { %v626_v28 = vpop.f32.mrf.mxu3  ;;  %v612_v29 = vpop.f32.mrf.mxu2 }
 0x355   : > { %v631_v30 = vmax.f32 %v612_v29, 0.0  ;;  %v632_v33 = vmax.f32 %v626_v28, 0.0 }
 0x35c   : > { %v628_v31 = vpop.f32.mrf.mxu3  ;;  %v614_v32 = vpop.f32.mrf.mxu2 }
 0x35d   : > { %v634_v34 = vmax.f32 %v628_v31, 0.0  ;;  %v633_v35 = vmax.f32 %v614_v32, 0.0 }
 0x35f   : > { %v1068_v36 = vpack.i.bf16 %v634_v34, %v632_v33  ;;  %v656_v37 = vpack.c.bf16 %v634_v34, %v632_v33  ;;  %v1063_v38 = vpack.i.bf16 %v633_v35, %v631_v30  ;;  %v655_v39 = vpack.c.bf16 %v633_v35, %v631_v30 }
 0x361   : > { %1069 = vrot.lane.b32.xlu0 %v1068_v36, %s1344_s11  ;;  %685 = vmatpush.bf16.msra.mxu1 %v656_v37 }
 0x362   : > { %1064 = vrot.lane.b32.xlu2 %v1063_v38, %s1344_s11  ;;  %671 = vmatpush.bf16.msra.mxu0 %v655_v39 }
 0x3bc   : > { %v1065_v40 = vpop.permute.xlu2 %1064 }
 0x3bd   : > { %v1067_v42 = vunpack.i.h.bf16 %v1065_v40  ;;  %v1066_v43 = vunpack.i.l.bf16 %v1065_v40 }
 0x3d3   : > { %v1070_v41 = vpop.permute.xlu0 %1069 }
 0x3d4   : > { %v1072_v44 = vunpack.i.h.bf16 %v1070_v41  ;;  %v1071_v45 = vunpack.i.l.bf16 %v1070_v41 }
 0x3d6   : > { %v643_v46 = vsel %vm578_vm15, %v1066_v43, %v1071_v45  ;;  %v644_v47 = vsel %vm578_vm15, %v1067_v42, %v1072_v44  ;;  %v645_v48 = vsel %vm578_vm15, %v1071_v45, %v1066_v43  ;;  %v646_v49 = vsel %vm578_vm15, %v1072_v44, %v1067_v42 }
 0x3d7   : > { %v912_v50 = vpack.c.bf16 %v646_v49, %v645_v48  ;;  %v916_v51 = vpack.c.bf16 %v644_v47, %v643_v46 }
 0x3d9   : > { %913 = vmatpush.bf16.msk.msra.mxu0 %vm1602_vm1, %v912_v50  ;;  %917 = vmatpush.bf16.msk.msra.mxu1 %vm903_vm2, %v916_v51 }
 0x3dc   : > { %914 = vmatmul.msk.bf16.vlgmr.msra.gmra.mxu0 %vm475_vm13, %v929_v52  ;;  %918 = vmatmul.msk.bf16.vlgmr.msra.gmra.mxu1 %vm475_vm13, %v929_v52 }
 0x459   : > { %v674_v53 = vpop.f32.mrf.mxu0  ;;  %v688_v7 = vpop.f32.mrf.mxu1 }
 0x45a   : > { %v693_v54 = vmax.f32 %v674_v53, 0.0  ;;  %v694_v55 = vmax.f32 %v688_v7, 0.0 }
 0x45c   : > { %v697_v56 = vadd.f32 %v693_v54, %v1578_v5  ;;  %v698_v57 = vadd.f32 %v694_v55, %v1576_v3 }
 0x45e   : > { %v701_v58 = vmax.f32 %v697_v56, 0.0  ;;  %v702_v59 = vmax.f32 %v698_v57, 0.0 }
 0x460   : > { %705 = vst [vmem:[%s352_s13] sm:$0xff] %v701_v58 }
 0x461   : > { %706 = vst [vmem:[%s352_s13 + $0x8] sm:$0xff] %v702_v59  ;;  %v676_v60 = vpop.f32.mrf.mxu0  ;;  %v690_v61 = vpop.f32.mrf.mxu1 }
 0x462   : > { %v695_v62 = vmax.f32 %v676_v60, 0.0  ;;  %v696_v63 = vmax.f32 %v690_v61, 0.0 }
 0x464   : > { %v699_v0 = vadd.f32 %v695_v62, %v1580_v6  ;;  %v700_v1 = vadd.f32 %v696_v63, %v1582_v10 }
 0x466   : > { %v703_v2 = vmax.f32 %v699_v0, 0.0  ;;  %v704_v3 = vmax.f32 %v700_v1, 0.0 }
 0x468   : > { %707 = vst [vmem:[%s352_s13 + $0x10] sm:$0xff] %v703_v2 }
 0x469   : > { %708 = vst [vmem:[%s352_s13 + $0x18] sm:$0xff] %v704_v3 }
 0x46a   : > { %1280 = shalt.err (!%p1277_p9)
}
 0x46b   : > { %s1345_s18 = smov 256   ;;  %s1346_s12 = smov 512  }
 0x46c   : > { %s1347_s13 = smov 16  }
 0x46d   : > { %953 = dma.vmem_to_hbm [thread:$0]  (%p1469_p13), %s723_s26, 512, %s725_s7, %s710_s28, %s1345_s18, %s1346_s12, %s1347_s13  }
 0x46e PF: > { %s739_s14 = sand.u32 1, %s1319_s21   ;;  %p1702_p10 = scmp.ge.s32.totalorder %s1331_s24, 2 }
 0x46f   : > { %s740_s16 = scalar_lea.sflag [#allocation4], %s739_s14 }
 0x470   : > { %p976_p11 = pnand %p1702_p10, %p1474_p4 }
 0x472   : > { %p977_p0 = pneg %p976_p11 }
 0x474   : > { %1314 = dma.done.wait (%p977_p0), %s740_s16, 512  }
 0x475   : > { %1316 = vsyncadd (%p977_p0), %s740_s16, 4294966784  ;;  %p22_p2 = scmp.ge.s32.totalorder %s1449_s15, 4   ;;  %s1703_s21 = smov %s1323_s22 }
 0x476   : > { %s1704_s22 = smov %s1327_s23  ;;  %s1705_s23 = smov %s1461_s20 }
 0x477   : > { %s1706_s24 = smov %s1449_s15  ;;  %24 = sbr.rel (!%p22_p2) target bundleno = 8 (0x8), region = 109 }
 0x47c   :  { %746 = vsyncpa [#allocation3], 1 }
 0x47d   :  { %748 = vsyncpa [#allocation3 + $0x1], 1 }
 0x47e   :  { %749 = vsyncpa [#allocation6], 1 }
 0x47f   :  { %750 = vsyncpa [#allocation9], 1 }
 0x480   :  { %751 = vsyncpa [#allocation12], 1 }
 0x481   :  { %752 = vsyncpa [#allocation4], 1 }
 0x482   :  { %754 = vsyncpa [#allocation4 + $0x1], 1 }

</bundles_post_ra>
